<compile_context>
chip_gen: v5e
topology: v5e:2x2
jax: 0.10.0
libtpu: 0.0.40
codegen_flags: <defaults>
</compile_context>

<pallas_src>
import jax
import jax.numpy as jnp
from jax.experimental import pallas as pl
from jax.experimental.pallas import tpu as pltpu

IGNORE_INDEX = -100

# ----------------------------- model sizes (lane-native stand-ins) ----------
N_NODES = 16          # real graph nodes
N_PAD = 128           # node axis padded to lane width
IN_CH = 8             # graph.x.shape[-1] (data-given)
IN_PAD = 128          # padded input-feature axis
GNN_HIDDEN = 128      # args.gnn_hidden_dim stand-in
GNN_OUT = 128         # args.gnn_out_dim stand-in
PROJ_HIDDEN = 128     # stands in for 2048
D_MODEL = 128         # stands in for LLaMA hidden 4096
FFN_DIM = 256
VOCAB = 256           # stands in for 32000
PAD_ID, BOS_ID, EOS_ID = 0, 1, 2
MAX_TXT_LEN = 4
SEQ_PAD = 128         # fixed (static) padded sequence length
B_PAD = 8             # graph-encoder output rows padded to sublane multiple


def _full_spec(shape):
    """Whole-array block for a grid=(1,) pallas_call."""
    zeros = (0,) * len(shape)
    return pl.BlockSpec(shape, lambda i, _z=zeros: _z)


# ----------------------------- fused graph encoder + projector --------------
def _graph_encoder_kernel(a_ref, x_ref, sel_ref,
                          w1_ref, b1_ref, w2_ref, b2_ref,
                          wp1_ref, bp1_ref, wp2_ref, bp2_ref, o_ref):
    # GCN layer 1: relu(A @ X @ W1 + b1)
    a = a_ref[...]
    agg = jnp.dot(a, x_ref[...], preferred_element_type=jnp.float32)
    h = jnp.maximum(
        jnp.dot(agg, w1_ref[...], preferred_element_type=jnp.float32) + b1_ref[...],
        0.0)
    # GCN layer 2: A @ H @ W2 + b2
    agg = jnp.dot(a, h, preferred_element_type=jnp.float32)
    h = jnp.dot(agg, w2_ref[...], preferred_element_type=jnp.float32) + b2_ref[...]
    # gather of prompt nodes fused as a one-hot matmul (B_PAD, N_PAD) @ (N_PAD, F)
    g = jnp.dot(sel_ref[...], h, preferred_element_type=jnp.float32)
    # projector: Linear -> Sigmoid -> Linear
    p = jax.nn.sigmoid(
        jnp.dot(g, wp1_ref[...], preferred_element_type=jnp.float32) + bp1_ref[...])
    out = jnp.dot(p, wp2_ref[...], preferred_element_type=jnp.float32) + bp2_ref[...]
    o_ref[...] = out.astype(o_ref.dtype)


def graph_encoder_projector(a_norm, x_pad, sel_onehot,
                            gnn_w1, gnn_b1, gnn_w2, gnn_b2,
                            proj_w1, proj_b1, proj_w2, proj_b2):
    return pl.pallas_call(
        _graph_encoder_kernel,
        grid=(1,),
        in_specs=[
            _full_spec((N_PAD, N_PAD)),
            _full_spec((N_PAD, IN_PAD)),
            _full_spec((B_PAD, N_PAD)),
            _full_spec((IN_PAD, GNN_HIDDEN)), _full_spec((1, GNN_HIDDEN)),
            _full_spec((GNN_HIDDEN, GNN_OUT)), _full_spec((1, GNN_OUT)),
            _full_spec((GNN_OUT, PROJ_HIDDEN)), _full_spec((1, PROJ_HIDDEN)),
            _full_spec((PROJ_HIDDEN, D_MODEL)), _full_spec((1, D_MODEL)),
        ],
        out_specs=_full_spec((B_PAD, D_MODEL)),
        out_shape=jax.ShapeDtypeStruct((B_PAD, D_MODEL), jnp.bfloat16),
        compiler_params=pltpu.CompilerParams(dimension_semantics=("arbitrary",)),
    )(a_norm, x_pad, sel_onehot,
      gnn_w1, gnn_b1, gnn_w2, gnn_b2, proj_w1, proj_b1, proj_w2, proj_b2)


# ----------------------------- causal-LM forward + CE loss ------------------
def _lm_loss_kernel(emb_ref, mask_ref, labels_ref,
                    wq_ref, wk_ref, wv_ref, wo_ref,
                    w1_ref, w2_ref, wlm_ref, o_ref):
    x32 = emb_ref[...].astype(jnp.float32)          # (B, L, D) f32 residual
    B, L, D = x32.shape
    mask = mask_ref[...]                            # (B, L) f32
    labels = labels_ref[...]                        # (B, L) int32, PRE-SHIFTED

    def rms(h):
        var = jnp.mean(h * h, axis=-1, keepdims=True)
        return h * jax.lax.rsqrt(var + 1e-6)

    # --- self attention (single head, causal + padding mask) ---------------
    # projections as 2-D (B*L, D) bf16 MXU matmuls, f32 accumulation
    h = rms(x32).astype(jnp.bfloat16).reshape(B * L, D)
    q = jnp.dot(h, wq_ref[...], preferred_element_type=jnp.float32)
    k = jnp.dot(h, wk_ref[...], preferred_element_type=jnp.float32)
    v = jnp.dot(h, wv_ref[...], preferred_element_type=jnp.float32)
    qb = q.astype(jnp.bfloat16).reshape(B, L, D)
    kb = k.astype(jnp.bfloat16).reshape(B, L, D)
    vb = v.astype(jnp.bfloat16).reshape(B, L, D)

    scores = jnp.einsum('bqe,bke->bqk', qb, kb,
                        preferred_element_type=jnp.float32) * (1.0 / (D ** 0.5))

    row = jax.lax.broadcasted_iota(jnp.int32, (L, L), 0)
    col = jax.lax.broadcasted_iota(jnp.int32, (L, L), 1)
    causal = (col <= row)[None, :, :]                                # (1, L, L)
    key_valid = (mask > 0.5)[:, None, :]                             # (B, 1, L)
    scores = jnp.where(causal & key_valid, scores, -1e30)

    m = jnp.max(scores, axis=-1, keepdims=True)
    e = jnp.exp(scores - m)
    # EUP approx reciprocal instead of a VALU divide per element
    probs = e * pl.reciprocal(jnp.sum(e, axis=-1, keepdims=True), approx=True)
    # explicitly zero fully-masked (left-pad) query rows for robustness
    probs = jnp.where((mask > 0.5)[:, :, None], probs, 0.0)

    attn = jnp.einsum('bqk,bke->bqe', probs.astype(jnp.bfloat16), vb,
                      preferred_element_type=jnp.float32)
    attn_o = jnp.dot(attn.astype(jnp.bfloat16).reshape(B * L, D), wo_ref[...],
                     preferred_element_type=jnp.float32)
    x32 = x32 + attn_o.reshape(B, L, D)

    # --- FFN ----------------------------------------------------------------
    h2 = rms(x32).astype(jnp.bfloat16).reshape(B * L, D)
    f = jnp.maximum(jnp.dot(h2, w1_ref[...], preferred_element_type=jnp.float32), 0.0)
    ffn_o = jnp.dot(f.astype(jnp.bfloat16), w2_ref[...],
                    preferred_element_type=jnp.float32)
    x32 = x32 + ffn_o.reshape(B, L, D)

    # --- LM head -------------------------------------------------------------
    hf = rms(x32).astype(jnp.bfloat16).reshape(B * L, D)
    logits = jnp.dot(hf, wlm_ref[...], preferred_element_type=jnp.float32)
    V = logits.shape[-1]
    logits = logits.reshape(B, L, V)

    # --- cross entropy against host-shifted labels (no logits slice/copy) ---
    lmax = jnp.max(logits, axis=-1, keepdims=True)
    lse = lmax[..., 0] + jnp.log(jnp.sum(jnp.exp(logits - lmax), axis=-1))   # (B, L)
    valid = labels != IGNORE_INDEX
    safe = jnp.where(valid, labels, 0)
    iota_v = jax.lax.broadcasted_iota(jnp.int32, (B, L, V), 2)
    onehot = (iota_v == safe[..., None]).astype(jnp.float32)
    picked = jnp.sum(logits * onehot, axis=-1)                               # (B, L)
    nll = lse - picked
    validf = valid.astype(jnp.float32)
    loss = jnp.sum(nll * validf) / jnp.maximum(jnp.sum(validf), 1.0)
    # (1,1) VMEM scalar output: a single masked 1-lane store is fine here.
    o_ref[0, 0] = loss


def lm_forward_loss(inputs_embeds, attention_mask, shift_labels, p):
    B, L, D = inputs_embeds.shape
    F = p['w1'].shape[1]
    V = p['wlm'].shape[1]
    out = pl.pallas_call(
        _lm_loss_kernel,
        grid=(1,),
        in_specs=[
            _full_spec((B, L, D)),
            _full_spec((B, L)),
            _full_spec((B, L)),
            _full_spec((D, D)), _full_spec((D, D)), _full_spec((D, D)), _full_spec((D, D)),
            _full_spec((D, F)), _full_spec((F, D)),
            _full_spec((D, V)),
        ],
        out_specs=_full_spec((1, 1)),
        out_shape=jax.ShapeDtypeStruct((1, 1), jnp.float32),
        compiler_params=pltpu.CompilerParams(dimension_semantics=("arbitrary",)),
    )(inputs_embeds, attention_mask.astype(jnp.float32),
      shift_labels.astype(jnp.int32),
      p['wq'], p['wk'], p['wv'], p['wo'], p['w1'], p['w2'], p['wlm'])
    return out[0, 0]


# ----------------------------- GraphLLM (JAX/Pallas) ------------------------
class GraphLLMPallas:
    def __init__(self, key):
        keys = jax.random.split(key, 12)
        # word embedding table (bf16, mimicking torch_dtype=bfloat16 LLaMA)
        self.word_embedding = (
            jax.random.normal(keys[0], (VOCAB, D_MODEL), jnp.float32) * 0.02
        ).astype(jnp.bfloat16)

        # graph encoder (2-layer GCN); W1 zero-padded once at init so the fused
        # kernel sees a lane-dense (IN_PAD, GNN_HIDDEN) operand.
        w1_real = jax.random.normal(keys[1], (IN_CH, GNN_HIDDEN), jnp.float32) / (IN_CH ** 0.5)
        self.gnn_w1 = jnp.zeros((IN_PAD, GNN_HIDDEN), jnp.float32).at[:IN_CH].set(w1_real)
        self.gnn_b1 = jnp.zeros((1, GNN_HIDDEN), jnp.float32)
        self.gnn_w2 = jax.random.normal(keys[2], (GNN_HIDDEN, GNN_OUT), jnp.float32) / (GNN_HIDDEN ** 0.5)
        self.gnn_b2 = jnp.zeros((1, GNN_OUT), jnp.float32)
        # projector: Linear(GNN_OUT, PROJ_HIDDEN) -> Sigmoid -> Linear(PROJ_HIDDEN, D_MODEL)
        self.proj_w1 = jax.random.normal(keys[3], (GNN_OUT, PROJ_HIDDEN), jnp.float32) / (GNN_OUT ** 0.5)
        self.proj_b1 = jnp.zeros((1, PROJ_HIDDEN), jnp.float32)
        self.proj_w2 = jax.random.normal(keys[4], (PROJ_HIDDEN, D_MODEL), jnp.float32) / (PROJ_HIDDEN ** 0.5)
        self.proj_b2 = jnp.zeros((1, D_MODEL), jnp.float32)

        # tiny bf16 causal-LM stub (bf16 weights feed the MXU directly)
        def lin(k, fin, fout):
            return (jax.random.normal(k, (fin, fout), jnp.float32) / (fin ** 0.5)
                    ).astype(jnp.bfloat16)
        self.lm = {
            'wq': lin(keys[5], D_MODEL, D_MODEL),
            'wk': lin(keys[6], D_MODEL, D_MODEL),
            'wv': lin(keys[7], D_MODEL, D_MODEL),
            'wo': lin(keys[8], D_MODEL, D_MODEL),
            'w1': lin(keys[9], D_MODEL, FFN_DIM),
            'w2': lin(keys[10], FFN_DIM, D_MODEL),
            'wlm': lin(keys[11], D_MODEL, VOCAB),
        }
        self.max_txt_len = MAX_TXT_LEN

    def encode_graphs(self, samples):
        x = samples['x']                      # (N, IN_CH) f32
        edge_index = samples['edge_index']    # (2, E) int32
        mapping = samples['mapping']          # (B,) int32
        n = x.shape[0]
        b = mapping.shape[0]

        # normalized dense adjacency with self loops (host glue: sparse scatter)
        adj = jnp.zeros((N_PAD, N_PAD), jnp.float32)
        adj = adj.at[edge_index[0], edge_index[1]].add(1.0)
        adj = jnp.minimum(adj + jnp.eye(N_PAD, dtype=jnp.float32), 1.0)
        deg = jnp.sum(adj, axis=1)
        dinv = 1.0 / jnp.sqrt(jnp.maximum(deg, 1.0))
        a_norm = adj * dinv[:, None] * dinv[None, :]
        node_valid = (jnp.arange(N_PAD) < n).astype(jnp.float32)
        a_norm = a_norm * node_valid[:, None] * node_valid[None, :]

        # lane-dense padded node features and one-hot gather matrix
        x_pad = jnp.zeros((N_PAD, IN_PAD), jnp.float32).at[:n, :IN_CH].set(x)
        sel = jnp.zeros((B_PAD, N_PAD), jnp.float32).at[jnp.arange(b), mapping].set(1.0)

        # single fused Pallas kernel: GCN x2 + gather + projector
        out = graph_encoder_projector(
            a_norm, x_pad, sel,
            self.gnn_w1, self.gnn_b1, self.gnn_w2, self.gnn_b2,
            self.proj_w1, self.proj_b1, self.proj_w2, self.proj_b2)
        # bf16 output, consistent with the bf16 LLaMA embedding stream
        return out[:b]

    def forward(self, samples):
        # samples['question'|'desc'|'label'] are pre-tokenized lists of int ids
        questions = samples['question']
        descriptions = samples['desc']
        labels = samples['label']

        pad_embeds = self.word_embedding[PAD_ID][None, :]   # (1, D)
        bos_embeds = self.word_embedding[BOS_ID][None, :]   # (1, D)
        graph_embeds = self.encode_graphs(samples)          # (B, D) bf16

        batch_size = len(samples['id'])
        embeds_rows, attn_rows, label_rows = [], [], []
        for i in range(batch_size):
            label_input_ids = list(labels[i]) + [EOS_ID]
            input_ids = (list(descriptions[i])[:self.max_txt_len]
                         + list(questions[i]) + label_input_ids)
            ids = jnp.asarray(input_ids, dtype=jnp.int32)
            tok_embeds = jnp.take(self.word_embedding, ids, axis=0)          # (T, D)
            emb = jnp.concatenate(
                [bos_embeds, graph_embeds[i][None, :], tok_embeds], axis=0)
            t = emb.shape[0]
            assert t <= SEQ_PAD, "sequence exceeds fixed SEQ_PAD"
            # left-pad everything to the SAME static length -> no recompiles,
            # lane-dense (B, L) / (B, L, L) tiles inside the kernel.
            pad_len = SEQ_PAD - t
            emb = jnp.concatenate([jnp.tile(pad_embeds, (pad_len, 1)), emb], axis=0)
            attn = [0] * pad_len + [1] * t
            lab = ([IGNORE_INDEX] * pad_len
                   + [IGNORE_INDEX] * (t - len(label_input_ids))
                   + label_input_ids)
            embeds_rows.append(emb)
            attn_rows.append(attn)
            label_rows.append(lab)

        inputs_embeds = jnp.stack(embeds_rows, axis=0)                # (B, L, D) bf16
        attention_mask = jnp.asarray(attn_rows, jnp.int32)            # (B, L)
        # shift labels host-side so the kernel never slices/copies the logits
        shifted = [row[1:] + [IGNORE_INDEX] for row in label_rows]
        shift_labels = jnp.asarray(shifted, jnp.int32)                # (B, L)

        # causal LM forward + shifted CE loss (single Pallas kernel)
        return lm_forward_loss(inputs_embeds, attention_mask, shift_labels, self.lm)


# ----------------------------- main -----------------------------------------
if __name__ == "__main__":
    key = jax.random.PRNGKey(0)
    k_model, k_x, k_e = jax.random.split(key, 3)

    model = GraphLLMPallas(k_model)

    # synthetic graph
    node_x = jax.random.normal(k_x, (N_NODES, IN_CH), jnp.float32)
    src = jax.random.randint(k_e, (32,), 0, N_NODES, dtype=jnp.int32)
    dst = jax.random.randint(jax.random.fold_in(k_e, 1), (32,), 0, N_NODES, dtype=jnp.int32)
    edge_index = jnp.stack([src, dst], axis=0)
    mapping = jnp.asarray([3, 7], dtype=jnp.int32)

    # synthetic pre-tokenized text (vocab ids in [3, VOCAB))
    samples = {
        'id': [0, 1],
        'x': node_x,
        'edge_index': edge_index,
        'mapping': mapping,
        'desc': [[10, 11, 12, 13, 14, 15], [20, 21, 22]],
        'question': [[30, 31], [40, 41, 42]],
        'label': [[50, 51], [60]],
    }

    loss = model.forward(samples)
    loss = jax.block_until_ready(loss)
    assert loss.shape == () and jnp.isfinite(loss)
    print("KERNEL_OK")
</pallas_src>

<mosaic_0001>
module attributes {stable_mosaic.version = 11 : i64} {
  func.func @_graph_encoder_kernel(%arg0: i32, %arg1: memref<128x128xf32, #tpu.memory_space<vmem>>, %arg2: memref<128x128xf32, #tpu.memory_space<vmem>>, %arg3: memref<8x128xf32, #tpu.memory_space<vmem>>, %arg4: memref<128x128xf32, #tpu.memory_space<vmem>>, %arg5: memref<1x128xf32, #tpu.memory_space<vmem>>, %arg6: memref<128x128xf32, #tpu.memory_space<vmem>>, %arg7: memref<1x128xf32, #tpu.memory_space<vmem>>, %arg8: memref<128x128xf32, #tpu.memory_space<vmem>>, %arg9: memref<1x128xf32, #tpu.memory_space<vmem>>, %arg10: memref<128x128xf32, #tpu.memory_space<vmem>>, %arg11: memref<1x128xf32, #tpu.memory_space<vmem>>, %arg12: memref<8x128xbf16, #tpu.memory_space<vmem>>) attributes {dimension_semantics = [#tpu.dimension_semantics<arbitrary>], iteration_bounds = array<i64: 1>, scalar_prefetch = 0 : i64, scratch_operands = 0 : i64, tpu.core_type = #tpu.core_type<tc>, window_params = [{pipeline_mode = #tpu.pipeline_mode<synchronous>, transform_indices = @transform_0, window_bounds = array<i64: 128, 128>}, {pipeline_mode = #tpu.pipeline_mode<synchronous>, transform_indices = @transform_1, window_bounds = array<i64: 128, 128>}, {pipeline_mode = #tpu.pipeline_mode<synchronous>, transform_indices = @transform_2, window_bounds = array<i64: 8, 128>}, {pipeline_mode = #tpu.pipeline_mode<synchronous>, transform_indices = @transform_3, window_bounds = array<i64: 128, 128>}, {pipeline_mode = #tpu.pipeline_mode<synchronous>, transform_indices = @transform_4, window_bounds = array<i64: 1, 128>}, {pipeline_mode = #tpu.pipeline_mode<synchronous>, transform_indices = @transform_5, window_bounds = array<i64: 128, 128>}, {pipeline_mode = #tpu.pipeline_mode<synchronous>, transform_indices = @transform_6, window_bounds = array<i64: 1, 128>}, {pipeline_mode = #tpu.pipeline_mode<synchronous>, transform_indices = @transform_7, window_bounds = array<i64: 128, 128>}, {pipeline_mode = #tpu.pipeline_mode<synchronous>, transform_indices = @transform_8, window_bounds = array<i64: 1, 128>}, {pipeline_mode = #tpu.pipeline_mode<synchronous>, transform_indices = @transform_9, window_bounds = array<i64: 128, 128>}, {pipeline_mode = #tpu.pipeline_mode<synchronous>, transform_indices = @transform_10, window_bounds = array<i64: 1, 128>}, {pipeline_mode = #tpu.pipeline_mode<synchronous>, transform_indices = @transform_11, window_bounds = array<i64: 8, 128>}]} {
    %c0 = arith.constant 0 : index
    %c0_0 = arith.constant 0 : index
    %0 = vector.load %arg1[%c0, %c0_0] : memref<128x128xf32, #tpu.memory_space<vmem>>, vector<128x128xf32>
    %c0_1 = arith.constant 0 : index
    %c0_2 = arith.constant 0 : index
    %1 = vector.load %arg2[%c0_1, %c0_2] : memref<128x128xf32, #tpu.memory_space<vmem>>, vector<128x128xf32>
    %cst = arith.constant dense<0.000000e+00> : vector<128x128xf32>
    %2 = tpu.matmul %0, %1, %cst {dimension_numbers = #tpu.dot_dimension_numbers<[1], [0], [0], [1], [0, 0, 1, 1], [], []>} : vector<128x128xf32>, vector<128x128xf32>, vector<128x128xf32> -> vector<128x128xf32>
    %c0_3 = arith.constant 0 : index
    %c0_4 = arith.constant 0 : index
    %3 = vector.load %arg4[%c0_3, %c0_4] : memref<128x128xf32, #tpu.memory_space<vmem>>, vector<128x128xf32>
    %cst_5 = arith.constant dense<0.000000e+00> : vector<128x128xf32>
    %4 = tpu.matmul %2, %3, %cst_5 {dimension_numbers = #tpu.dot_dimension_numbers<[1], [0], [0], [1], [0, 0, 1, 1], [], []>} : vector<128x128xf32>, vector<128x128xf32>, vector<128x128xf32> -> vector<128x128xf32>
    %c0_6 = arith.constant 0 : index
    %c0_7 = arith.constant 0 : index
    %5 = vector.load %arg5[%c0_6, %c0_7] : memref<1x128xf32, #tpu.memory_space<vmem>>, vector<1x128xf32>
    %6 = vector.broadcast %5 : vector<1x128xf32> to vector<128x128xf32>
    %7 = arith.addf %4, %6 : vector<128x128xf32>
    %cst_8 = arith.constant 0.000000e+00 : f32
    %8 = vector.broadcast %cst_8 : f32 to vector<128x128xf32>
    %9 = arith.maximumf %7, %8 : vector<128x128xf32>
    %cst_9 = arith.constant dense<0.000000e+00> : vector<128x128xf32>
    %10 = tpu.matmul %0, %9, %cst_9 {dimension_numbers = #tpu.dot_dimension_numbers<[1], [0], [0], [1], [0, 0, 1, 1], [], []>} : vector<128x128xf32>, vector<128x128xf32>, vector<128x128xf32> -> vector<128x128xf32>
    %c0_10 = arith.constant 0 : index
    %c0_11 = arith.constant 0 : index
    %11 = vector.load %arg6[%c0_10, %c0_11] : memref<128x128xf32, #tpu.memory_space<vmem>>, vector<128x128xf32>
    %cst_12 = arith.constant dense<0.000000e+00> : vector<128x128xf32>
    %12 = tpu.matmul %10, %11, %cst_12 {dimension_numbers = #tpu.dot_dimension_numbers<[1], [0], [0], [1], [0, 0, 1, 1], [], []>} : vector<128x128xf32>, vector<128x128xf32>, vector<128x128xf32> -> vector<128x128xf32>
    %c0_13 = arith.constant 0 : index
    %c0_14 = arith.constant 0 : index
    %13 = vector.load %arg7[%c0_13, %c0_14] : memref<1x128xf32, #tpu.memory_space<vmem>>, vector<1x128xf32>
    %14 = vector.broadcast %13 : vector<1x128xf32> to vector<128x128xf32>
    %15 = arith.addf %12, %14 : vector<128x128xf32>
    %c0_15 = arith.constant 0 : index
    %c0_16 = arith.constant 0 : index
    %16 = vector.load %arg3[%c0_15, %c0_16] : memref<8x128xf32, #tpu.memory_space<vmem>>, vector<8x128xf32>
    %cst_17 = arith.constant dense<0.000000e+00> : vector<8x128xf32>
    %17 = tpu.matmul %16, %15, %cst_17 {dimension_numbers = #tpu.dot_dimension_numbers<[1], [0], [0], [1], [0, 0, 1, 1], [], []>} : vector<8x128xf32>, vector<128x128xf32>, vector<8x128xf32> -> vector<8x128xf32>
    %c0_18 = arith.constant 0 : index
    %c0_19 = arith.constant 0 : index
    %18 = vector.load %arg8[%c0_18, %c0_19] : memref<128x128xf32, #tpu.memory_space<vmem>>, vector<128x128xf32>
    %cst_20 = arith.constant dense<0.000000e+00> : vector<8x128xf32>
    %19 = tpu.matmul %17, %18, %cst_20 {dimension_numbers = #tpu.dot_dimension_numbers<[1], [0], [0], [1], [0, 0, 1, 1], [], []>} : vector<8x128xf32>, vector<128x128xf32>, vector<8x128xf32> -> vector<8x128xf32>
    %c0_21 = arith.constant 0 : index
    %c0_22 = arith.constant 0 : index
    %20 = vector.load %arg9[%c0_21, %c0_22] : memref<1x128xf32, #tpu.memory_space<vmem>>, vector<1x128xf32>
    %21 = vector.broadcast %20 : vector<1x128xf32> to vector<8x128xf32>
    %22 = arith.addf %19, %21 : vector<8x128xf32>
    %23 = arith.negf %22 : vector<8x128xf32>
    %24 = math.exp %23 : vector<8x128xf32>
    %cst_23 = arith.constant 1.000000e+00 : f32
    %25 = vector.broadcast %cst_23 : f32 to vector<8x128xf32>
    %26 = arith.addf %25, %24 : vector<8x128xf32>
    %27 = arith.divf %25, %26 : vector<8x128xf32>
    %c0_24 = arith.constant 0 : index
    %c0_25 = arith.constant 0 : index
    %28 = vector.load %arg10[%c0_24, %c0_25] : memref<128x128xf32, #tpu.memory_space<vmem>>, vector<128x128xf32>
    %cst_26 = arith.constant dense<0.000000e+00> : vector<8x128xf32>
    %29 = tpu.matmul %27, %28, %cst_26 {dimension_numbers = #tpu.dot_dimension_numbers<[1], [0], [0], [1], [0, 0, 1, 1], [], []>} : vector<8x128xf32>, vector<128x128xf32>, vector<8x128xf32> -> vector<8x128xf32>
    %c0_27 = arith.constant 0 : index
    %c0_28 = arith.constant 0 : index
    %30 = vector.load %arg11[%c0_27, %c0_28] : memref<1x128xf32, #tpu.memory_space<vmem>>, vector<1x128xf32>
    %31 = vector.broadcast %30 : vector<1x128xf32> to vector<8x128xf32>
    %32 = arith.addf %29, %31 : vector<8x128xf32>
    %33 = arith.truncf %32 : vector<8x128xf32> to vector<8x128xbf16>
    %c0_29 = arith.constant 0 : index
    %c0_30 = arith.constant 0 : index
    %34 = vector.load %arg12[%c0_29, %c0_30] : memref<8x128xbf16, #tpu.memory_space<vmem>>, vector<8x128xbf16>
    tpu.vector_store %arg12[%c0_29, %c0_30], %33 {strides = array<i32>} : memref<8x128xbf16, #tpu.memory_space<vmem>>, vector<8x128xbf16>,
    return
  }
  func.func @transform_0(%arg0: i32) -> (i32, i32) {
    %c0_i32 = arith.constant 0 : i32
    %c0_i32_0 = arith.constant 0 : i32
    %c0_i32_1 = arith.constant 0 : i32
    return %c0_i32, %c0_i32_0 : i32, i32
  }
  func.func @transform_1(%arg0: i32) -> (i32, i32) {
    %c0_i32 = arith.constant 0 : i32
    %c0_i32_0 = arith.constant 0 : i32
    %c0_i32_1 = arith.constant 0 : i32
    return %c0_i32, %c0_i32_0 : i32, i32
  }
  func.func @transform_2(%arg0: i32) -> (i32, i32) {
    %c0_i32 = arith.constant 0 : i32
    %c0_i32_0 = arith.constant 0 : i32
    %c0_i32_1 = arith.constant 0 : i32
    return %c0_i32, %c0_i32_0 : i32, i32
  }
  func.func @transform_3(%arg0: i32) -> (i32, i32) {
    %c0_i32 = arith.constant 0 : i32
    %c0_i32_0 = arith.constant 0 : i32
    %c0_i32_1 = arith.constant 0 : i32
    return %c0_i32, %c0_i32_0 : i32, i32
  }
  func.func @transform_4(%arg0: i32) -> (i32, i32) {
    %c0_i32 = arith.constant 0 : i32
    %c0_i32_0 = arith.constant 0 : i32
    %c0_i32_1 = arith.constant 0 : i32
    return %c0_i32, %c0_i32_0 : i32, i32
  }
  func.func @transform_5(%arg0: i32) -> (i32, i32) {
    %c0_i32 = arith.constant 0 : i32
    %c0_i32_0 = arith.constant 0 : i32
    %c0_i32_1 = arith.constant 0 : i32
    return %c0_i32, %c0_i32_0 : i32, i32
  }
  func.func @transform_6(%arg0: i32) -> (i32, i32) {
    %c0_i32 = arith.constant 0 : i32
    %c0_i32_0 = arith.constant 0 : i32
    %c0_i32_1 = arith.constant 0 : i32
    return %c0_i32, %c0_i32_0 : i32, i32
  }
  func.func @transform_7(%arg0: i32) -> (i32, i32) {
    %c0_i32 = arith.constant 0 : i32
    %c0_i32_0 = arith.constant 0 : i32
    %c0_i32_1 = arith.constant 0 : i32
    return %c0_i32, %c0_i32_0 : i32, i32
  }
  func.func @transform_8(%arg0: i32) -> (i32, i32) {
    %c0_i32 = arith.constant 0 : i32
    %c0_i32_0 = arith.constant 0 : i32
    %c0_i32_1 = arith.constant 0 : i32
    return %c0_i32, %c0_i32_0 : i32, i32
  }
  func.func @transform_9(%arg0: i32) -> (i32, i32) {
    %c0_i32 = arith.constant 0 : i32
    %c0_i32_0 = arith.constant 0 : i32
    %c0_i32_1 = arith.constant 0 : i32
    return %c0_i32, %c0_i32_0 : i32, i32
  }
  func.func @transform_10(%arg0: i32) -> (i32, i32) {
    %c0_i32 = arith.constant 0 : i32
    %c0_i32_0 = arith.constant 0 : i32
    %c0_i32_1 = arith.constant 0 : i32
    return %c0_i32, %c0_i32_0 : i32, i32
  }
  func.func @transform_11(%arg0: i32) -> (i32, i32) {
    %c0_i32 = arith.constant 0 : i32
    %c0_i32_0 = arith.constant 0 : i32
    %c0_i32_1 = arith.constant 0 : i32
    return %c0_i32, %c0_i32_0 : i32, i32
  }
}

</mosaic_0001>

<bundles_post_ra>
// kernel: tpu_custom_call.1
= control target key start
LH: loop header
LB: loop body
LE: loop exit
PB: predicated region body
PF: predicated region fallthrough
CT: control target
= control target key end

     0   :  { %16 = vsyncpa [#allocation3], 0  ;;  %s1054_s0 = inlined_call_operand.hbm [shape: f32[128,128], index: 0, kind: input, shape index: {}]   ;;  %s1055_s1 = inlined_call_operand.hbm [shape: f32[128,128], index: 1, kind: input, shape index: {}]   ;;  %s1056_s2 = inlined_call_operand.hbm [shape: f32[8,128], index: 2, kind: input, shape index: {}]   ;;  %s1057_s3 = inlined_call_operand.hbm [shape: f32[128,128], index: 3, kind: input, shape index: {}]   ;;  %s1058_s4 = inlined_call_operand.vmem [shape: f32[1,128], index: 4, kind: input, shape index: {}]   ;;  %s1059_s5 = inlined_call_operand.hbm [shape: f32[128,128], index: 5, kind: input, shape index: {}]   ;;  %s1060_s6 = inlined_call_operand.vmem [shape: f32[1,128], index: 6, kind: input, shape index: {}]   ;;  %s1061_s7 = inlined_call_operand.hbm [shape: f32[128,128], index: 7, kind: input, shape index: {}]   ;;  %s1062_s8 = inlined_call_operand.vmem [shape: f32[1,128], index: 8, kind: input, shape index: {}]   ;;  %s1063_s9 = inlined_call_operand.hbm [shape: f32[128,128], index: 9, kind: input, shape index: {}]   ;;  %s1064_s10 = inlined_call_operand.vmem [shape: f32[1,128], index: 10, kind: input, shape index: {}]   ;;  %s1065_s11 = inlined_call_operand.hbm [shape: bf16[8,128], index: 11, kind: output, shape index: {}]  }
   0x1   :  { %17 = vsyncpa [#allocation6], 0 }
   0x2   :  { %18 = vsyncpa [#allocation9], 0 }
   0x3   :  { %19 = vsyncpa [#allocation12], 0 }
   0x4   :  { %20 = vsyncpa [#allocation4], 0  ;;  %s38_s19 = sshll.u32 %s1055_s1, 4  ;;  %s857_s20 = smov [#allocation5]   ;;  %s39_s19 = int_to_ptr.hbm [resolvable:$true] %s38_s19 }
   0x5   :  { %s40_s21 = sshll.u32 %s857_s20, 4  ;;  %s62_s24 = sshll.u32 %s1057_s3, 4  ;;  %s41_s21 = int_to_ptr.vmem [resolvable:$true] %s40_s21  ;;  %s63_s24 = int_to_ptr.hbm [resolvable:$true] %s62_s24 }
   0x6   :  { %s858_s25 = smov 128   ;;  %s859_s26 = smov 8  }
   0x7   :  { %46 = dma.hbm_to_vmem [thread:$0]  %s39_s19, 2048, %s41_s21, [#allocation6], %s858_s25, %s858_s25, %s859_s26  }
   0x8   :  { %s860_s27 = smov [#allocation8]   ;;  %s92_s1 = sshll.u32 %s1061_s7, 4  ;;  %s93_s1 = int_to_ptr.hbm [resolvable:$true] %s92_s1 }
   0x9   :  { %s64_s28 = sshll.u32 %s860_s27, 4  ;;  %s25_s13 = sshll.u32 %s1054_s0, 4  ;;  %s65_s28 = int_to_ptr.vmem [resolvable:$true] %s64_s28  ;;  %s26_s13 = int_to_ptr.hbm [resolvable:$true] %s25_s13 }
   0xa   :  { %70 = dma.hbm_to_vmem [thread:$0]  %s63_s24, 2048, %s65_s28, [#allocation9], %s858_s25, %s858_s25, %s859_s26  }
   0xb   :  { %s861_s14 = smov [#allocation11]   ;;  %s862_s16 = smov [#allocation2]  }
   0xc   :  { %s94_s15 = sshll.u32 %s861_s14, 4  ;;  %s27_s7 = sshll.u32 %s862_s16, 4  ;;  %s95_s15 = int_to_ptr.vmem [resolvable:$true] %s94_s15  ;;  %s28_s7 = int_to_ptr.vmem [resolvable:$true] %s27_s7 }
   0xd   :  { %100 = dma.hbm_to_vmem [thread:$0]  %s93_s1, 2048, %s95_s15, [#allocation12], %s858_s25, %s858_s25, %s859_s26  }
   0xe   :  { %s52_s19 = sshll.u32 %s1056_s2, 4  ;;  %s77_s21 = sshll.u32 %s1059_s5, 4  ;;  %s53_s19 = int_to_ptr.hbm [resolvable:$true] %s52_s19  ;;  %s78_s21 = int_to_ptr.hbm [resolvable:$true] %s77_s21 }
   0xf   :  { %33 = dma.hbm_to_vmem [thread:$0]  %s26_s13, 2048, %s28_s7, [#allocation3], %s858_s25, %s858_s25, %s859_s26  }
  0x10   :  { %s863_s22 = smov [#allocation7]   ;;  %s864_s24 = smov [#allocation10]  }
  0x11   :  { %s54_s23 = sshll.u32 %s863_s22, 4  ;;  %s79_s27 = sshll.u32 %s864_s24, 4  ;;  %s55_s23 = int_to_ptr.vmem [resolvable:$true] %s54_s23  ;;  %s80_s27 = int_to_ptr.vmem [resolvable:$true] %s79_s27 }
  0x12   :  { %57 = dma.hbm_to_vmem [thread:$0]  %s53_s19, 128, %s55_s23, [#allocation6]  }
  0x13   :  { %s107_s2 = sshll.u32 %s1063_s9, 4  ;;  %s865_s30 = smov [#allocation13]   ;;  %s108_s2 = int_to_ptr.hbm [resolvable:$true] %s107_s2 }
  0x14   :  { %85 = dma.hbm_to_vmem [thread:$0]  %s78_s21, 2048, %s80_s27, [#allocation9], %s858_s25, %s858_s25, %s859_s26  }
  0x15   :  { %s109_s1 = sshll.u32 %s865_s30, 4  ;;  %s110_s1 = int_to_ptr.vmem [resolvable:$true] %s109_s1 }
  0x16   :  { %115 = dma.hbm_to_vmem [thread:$0]  %s108_s2, 2048, %s110_s1, [#allocation12], %s858_s25, %s858_s25, %s859_s26  }
  0x17   :  { %847 = dma.done.wait [#allocation3], 2048  }
  0x18   :  { %848 = vsyncadd [#allocation3], 4294965248 }
  0x19   :  { %849 = dma.done.wait [#allocation6], 2176  }
  0x1a   :  { %850 = vsyncadd [#allocation6], 4294965120 }
  0x1b   :  { %851 = dma.done.wait [#allocation9], 4096  }
  0x1c   :  { %852 = vsyncadd [#allocation9], 4294963200 }
  0x1d   :  { %853 = dma.done.wait [#allocation12], 4096  }
  0x1e   :  { %854 = vsyncadd [#allocation12], 4294963200  ;;  %v177_v0 = vld [vmem:[#allocation5 + $0x78] sm:$0xff]  ;;  %v176_v1 = vld [vmem:[#allocation5 + $0x70] sm:$0xff]  ;;  %s866_s12 = smov [#allocation14]   ;;  %s623_s16 = sshll.u32 %s1065_s11, 4  ;;  %s624_s16 = int_to_ptr.hbm [resolvable:$true] %s623_s16 }
  0x1f   :  { %178 = vmatpush.msra.mxu0 %v177_v0  ;;  %v175_v2 = vld [vmem:[#allocation5 + $0x68] sm:$0xff]  ;;  %v174_v3 = vld [vmem:[#allocation5 + $0x60] sm:$0xff]  ;;  %v173_v4 = vld [vmem:[#allocation5 + $0x58] sm:$0xff]  ;;  %s621_s13 = sshll.u32 %s866_s12, 4  ;;  %s622_s13 = int_to_ptr.vmem [resolvable:$true] %s621_s13 }
  0x20   :  { %v172_v5 = vld [vmem:[#allocation5 + $0x50] sm:$0xff]  ;;  %v171_v6 = vld [vmem:[#allocation5 + $0x48] sm:$0xff]  ;;  %v170_v7 = vld [vmem:[#allocation5 + $0x40] sm:$0xff] }
  0x21   :  { %179 = vmatpush.msra.mxu0 %v176_v1  ;;  %v169_v8 = vld [vmem:[#allocation5 + $0x38] sm:$0xff]  ;;  %v168_v9 = vld [vmem:[#allocation5 + $0x30] sm:$0xff]  ;;  %v167_v10 = vld [vmem:[#allocation5 + $0x28] sm:$0xff] }
  0x22   :  { %v166_v11 = vld [vmem:[#allocation5 + $0x20] sm:$0xff]  ;;  %v165_v12 = vld [vmem:[#allocation5 + $0x18] sm:$0xff]  ;;  %v164_v13 = vld [vmem:[#allocation5 + $0x10] sm:$0xff] }
  0x23   :  { %180 = vmatpush.msra.mxu0 %v175_v2  ;;  %v163_v14 = vld [vmem:[#allocation5 + $0x8] sm:$0xff]  ;;  %v162_v15 = vld [vmem:[#allocation5] sm:$0xff]  ;;  %v972_v18 = vld [vmem:[#allocation2 + $0x10] sm:$0xff] }
  0x24   :  { %v966_v16 = vld [vmem:[#allocation2] sm:$0xff]  ;;  %v969_v17 = vld [vmem:[#allocation2 + $0x8] sm:$0xff]  ;;  %v975_v19 = vld [vmem:[#allocation2 + $0x18] sm:$0xff] }
  0x25   :  { %181 = vmatpush.msra.mxu0 %v174_v3  ;;  %v978_v20 = vld [vmem:[#allocation2 + $0x20] sm:$0xff]  ;;  %v981_v21 = vld [vmem:[#allocation2 + $0x28] sm:$0xff]  ;;  %v984_v22 = vld [vmem:[#allocation2 + $0x30] sm:$0xff] }
  0x26   :  { %v987_v23 = vld [vmem:[#allocation2 + $0x38] sm:$0xff]  ;;  %v258_v24 = vld [vmem:[#allocation8 + $0x78] sm:$0xff]  ;;  %v256_v27 = vld [vmem:[#allocation8 + $0x68] sm:$0xff] }
  0x27   :  { %182 = vmatpush.msra.mxu0 %v173_v4  ;;  %263 = vmatpush.msra.mxu1 %v258_v24  ;;  %v990_v25 = vld [vmem:[#allocation2 + $0x40] sm:$0xff]  ;;  %v257_v26 = vld [vmem:[#allocation8 + $0x70] sm:$0xff]  ;;  %v255_v28 = vld [vmem:[#allocation8 + $0x60] sm:$0xff] }
  0x28   :  { %v254_v29 = vld [vmem:[#allocation8 + $0x58] sm:$0xff]  ;;  %v993_v30 = vld [vmem:[#allocation2 + $0x48] sm:$0xff]  ;;  %v253_v31 = vld [vmem:[#allocation8 + $0x50] sm:$0xff] }
  0x29   :  { %183 = vmatpush.msra.mxu0 %v172_v5  ;;  %264 = vmatpush.msra.mxu1 %v257_v26  ;;  %v252_v32 = vld [vmem:[#allocation8 + $0x48] sm:$0xff]  ;;  %v251_v33 = vld [vmem:[#allocation8 + $0x40] sm:$0xff]  ;;  %v250_v34 = vld [vmem:[#allocation8 + $0x38] sm:$0xff] }
  0x2a   :  { %v996_v35 = vld [vmem:[#allocation2 + $0x50] sm:$0xff]  ;;  %v249_v36 = vld [vmem:[#allocation8 + $0x30] sm:$0xff]  ;;  %v247_v38 = vld [vmem:[#allocation8 + $0x20] sm:$0xff] }
  0x2b   :  { %184 = vmatpush.msra.mxu0 %v171_v6  ;;  %265 = vmatpush.msra.mxu1 %v256_v27  ;;  %v248_v37 = vld [vmem:[#allocation8 + $0x28] sm:$0xff]  ;;  %v246_v39 = vld [vmem:[#allocation8 + $0x18] sm:$0xff]  ;;  %v999_v40 = vld [vmem:[#allocation2 + $0x58] sm:$0xff] }
  0x2c   :  { %v245_v41 = vld [vmem:[#allocation8 + $0x10] sm:$0xff]  ;;  %v244_v42 = vld [vmem:[#allocation8 + $0x8] sm:$0xff]  ;;  %v243_v43 = vld [vmem:[#allocation8] sm:$0xff] }
  0x2d   :  { %185 = vmatpush.msra.mxu0 %v170_v7  ;;  %266 = vmatpush.msra.mxu1 %v255_v28  ;;  %v1002_v44 = vld [vmem:[#allocation2 + $0x60] sm:$0xff]  ;;  %v1005_v45 = vld [vmem:[#allocation2 + $0x68] sm:$0xff]  ;;  %v1008_v46 = vld [vmem:[#allocation2 + $0x70] sm:$0xff] }
  0x2e   :  { %v1011_v47 = vld [vmem:[#allocation2 + $0x78] sm:$0xff] }
  0x2f   :  { %186 = vmatpush.msra.mxu0 %v169_v8  ;;  %267 = vmatpush.msra.mxu1 %v254_v29 }
  0x31   :  { %187 = vmatpush.msra.mxu0 %v168_v9  ;;  %268 = vmatpush.msra.mxu1 %v253_v31 }
  0x33   :  { %188 = vmatpush.msra.mxu0 %v167_v10  ;;  %269 = vmatpush.msra.mxu1 %v252_v32 }
  0x35   :  { %189 = vmatpush.msra.mxu0 %v166_v11  ;;  %270 = vmatpush.msra.mxu1 %v251_v33 }
  0x37   :  { %190 = vmatpush.msra.mxu0 %v165_v12  ;;  %271 = vmatpush.msra.mxu1 %v250_v34 }
  0x39   :  { %191 = vmatpush.msra.mxu0 %v164_v13  ;;  %272 = vmatpush.msra.mxu1 %v249_v36 }
  0x3b   :  { %192 = vmatpush.msra.mxu0 %v163_v14  ;;  %273 = vmatpush.msra.mxu1 %v248_v37 }
  0x3d   :  { %193 = vmatpush.msra.mxu0 %v162_v15  ;;  %274 = vmatpush.msra.mxu1 %v247_v38  ;;  %v647_v15 = vld [vmem:[%s1058_s4] ss:$0 sm:$0xff] }
  0x3e   :  { %194 = vmatmul.f32.vlgmr.msra.gmra.mxu0 %v966_v16 }
  0x3f   :  { %275 = vmatpush.msra.mxu1 %v246_v39 }
  0x41   :  { %276 = vmatpush.msra.mxu1 %v245_v41 }
  0x43   :  { %277 = vmatpush.msra.mxu1 %v244_v42 }
  0x45   :  { %278 = vmatpush.msra.mxu1 %v243_v43 }
  0x46   :  { %197 = vmatmul.f32.gmra.mxu0 %v969_v17 }
  0x4e   :  { %200 = vmatmul.f32.gmra.mxu0 %v972_v18 }
  0x56   :  { %203 = vmatmul.f32.gmra.mxu0 %v975_v19 }
  0x5e   :  { %206 = vmatmul.f32.gmra.mxu0 %v978_v20 }
  0x66   :  { %209 = vmatmul.f32.gmra.mxu0 %v981_v21 }
  0x6e   :  { %212 = vmatmul.f32.gmra.mxu0 %v984_v22 }
  0x76   :  { %215 = vmatmul.f32.gmra.mxu0 %v987_v23 }
  0x7e   :  { %218 = vmatmul.f32.gmra.mxu0 %v990_v25 }
  0x86   :  { %221 = vmatmul.f32.gmra.mxu0 %v993_v30 }
  0x8e   :  { %224 = vmatmul.f32.gmra.mxu0 %v996_v35 }
  0x96   :  { %227 = vmatmul.f32.gmra.mxu0 %v999_v40 }
  0x9e   :  { %230 = vmatmul.f32.gmra.mxu0 %v1002_v44 }
  0xa6   :  { %233 = vmatmul.f32.gmra.mxu0 %v1005_v45 }
  0xae   :  { %236 = vmatmul.f32.gmra.mxu0 %v1008_v46 }
  0xb6   :  { %239 = vmatmul.f32.gmra.mxu0 %v1011_v47 }
  0xbb   :  { %v195_v48 = vpop.f32.mrf.mxu0 }
  0xbc   :  { %279 = vmatmul.f32.vlgmr.msra.gmra.mxu1 %v195_v48 }
  0xc3   :  { %v198_v49 = vpop.f32.mrf.mxu0 }
  0xc4   :  { %282 = vmatmul.f32.gmra.mxu1 %v198_v49 }
  0xcb   :  { %v201_v50 = vpop.f32.mrf.mxu0 }
  0xcc   :  { %285 = vmatmul.f32.gmra.mxu1 %v201_v50 }
  0xd3   :  { %v204_v51 = vpop.f32.mrf.mxu0 }
  0xd4   :  { %288 = vmatmul.f32.gmra.mxu1 %v204_v51 }
  0xdb   :  { %v207_v52 = vpop.f32.mrf.mxu0 }
  0xdc   :  { %291 = vmatmul.f32.gmra.mxu1 %v207_v52 }
  0xe3   :  { %v210_v53 = vpop.f32.mrf.mxu0 }
  0xe4   :  { %294 = vmatmul.f32.gmra.mxu1 %v210_v53 }
  0xeb   :  { %v213_v54 = vpop.f32.mrf.mxu0 }
  0xec   :  { %297 = vmatmul.f32.gmra.mxu1 %v213_v54 }
  0xf3   :  { %v216_v55 = vpop.f32.mrf.mxu0 }
  0xf4   :  { %300 = vmatmul.f32.gmra.mxu1 %v216_v55 }
  0xfb   :  { %v219_v56 = vpop.f32.mrf.mxu0 }
  0xfc   :  { %303 = vmatmul.f32.gmra.mxu1 %v219_v56 }
 0x103   :  { %v222_v57 = vpop.f32.mrf.mxu0 }
 0x104   :  { %306 = vmatmul.f32.gmra.mxu1 %v222_v57 }
 0x10b   :  { %v225_v58 = vpop.f32.mrf.mxu0 }
 0x10c   :  { %309 = vmatmul.f32.gmra.mxu1 %v225_v58 }
 0x113   :  { %v228_v59 = vpop.f32.mrf.mxu0 }
 0x114   :  { %312 = vmatmul.f32.gmra.mxu1 %v228_v59 }
 0x11b   :  { %v231_v60 = vpop.f32.mrf.mxu0 }
 0x11c   :  { %315 = vmatmul.f32.gmra.mxu1 %v231_v60 }
 0x123   :  { %v234_v61 = vpop.f32.mrf.mxu0 }
 0x124   :  { %318 = vmatmul.f32.gmra.mxu1 %v234_v61 }
 0x12b   :  { %v237_v62 = vpop.f32.mrf.mxu0 }
 0x12c   :  { %321 = vmatmul.f32.gmra.mxu1 %v237_v62 }
 0x133   :  { %v240_v63 = vpop.f32.mrf.mxu0 }
 0x134   :  { %324 = vmatmul.f32.gmra.mxu1 %v240_v63 }
 0x139   :  { %v280_v0 = vpop.f32.mrf.mxu1 }
 0x13a   :  { %v281_v61 = vadd.f32 %v647_v15, %v280_v0  ;;  %v424_v0 = vld [vmem:[#allocation10 + $0x78] sm:$0xff] }
 0x13b   :  { %429 = vmatpush.msra.mxu3 %v424_v0 }
 0x141   :  { %v283_v1 = vpop.f32.mrf.mxu1 }
 0x142   :  { %v284_v59 = vadd.f32 %v647_v15, %v283_v1  ;;  %v423_v1 = vld [vmem:[#allocation10 + $0x70] sm:$0xff] }
 0x143   :  { %430 = vmatpush.msra.mxu3 %v423_v1  ;;  %v522_v1 = vld [vmem:[#allocation11 + $0x38] sm:$0xff] }
 0x144   :  { %v329_v63 = vmax.f32 %v284_v59, 0.0 }
 0x149   :  { %v286_v2 = vpop.f32.mrf.mxu1 }
 0x14a   :  { %v287_v57 = vadd.f32 %v647_v15, %v286_v2  ;;  %v412_v2 = vld [vmem:[#allocation10 + $0x18] sm:$0xff] }
 0x14c   :  { %v330_v62 = vmax.f32 %v287_v57, 0.0 }
 0x151   :  { %v289_v3 = vpop.f32.mrf.mxu1 }
 0x152   :  { %v290_v55 = vadd.f32 %v647_v15, %v289_v3  ;;  %v411_v3 = vld [vmem:[#allocation10 + $0x10] sm:$0xff] }
 0x154   :  { %v331_v60 = vmax.f32 %v290_v55, 0.0 }
 0x159   :  { %v292_v4 = vpop.f32.mrf.mxu1 }
 0x15a   :  { %v293_v53 = vadd.f32 %v647_v15, %v292_v4  ;;  %v410_v4 = vld [vmem:[#allocation10 + $0x8] sm:$0xff] }
 0x15c   :  { %v332_v58 = vmax.f32 %v293_v53, 0.0 }
 0x161   :  { %v295_v5 = vpop.f32.mrf.mxu1 }
 0x162   :  { %v296_v51 = vadd.f32 %v647_v15, %v295_v5  ;;  %v328_v5 = vmax.f32 %v281_v61, 0.0 }
 0x164   :  { %v333_v56 = vmax.f32 %v296_v51, 0.0  ;;  %v530_v51 = vld [vmem:[#allocation11 + $0x78] sm:$0xff] }
 0x165   :  { %535 = vmatpush.msrb.mxu1 %v530_v51 }
 0x169   :  { %v298_v6 = vpop.f32.mrf.mxu1 }
 0x16a   :  { %v299_v49 = vadd.f32 %v647_v15, %v298_v6 }
 0x16c   :  { %v334_v54 = vmax.f32 %v299_v49, 0.0 }
 0x171   :  { %v301_v7 = vpop.f32.mrf.mxu1 }
 0x172   :  { %v302_v43 = vadd.f32 %v647_v15, %v301_v7 }
 0x174   :  { %v335_v52 = vmax.f32 %v302_v43, 0.0 }
 0x179   :  { %v304_v8 = vpop.f32.mrf.mxu1 }
 0x17a   :  { %v305_v41 = vadd.f32 %v647_v15, %v304_v8 }
 0x17c   :  { %v336_v50 = vmax.f32 %v305_v41, 0.0 }
 0x181   :  { %v307_v9 = vpop.f32.mrf.mxu1 }
 0x182   :  { %v308_v38 = vadd.f32 %v647_v15, %v307_v9 }
 0x184   :  { %v337_v48 = vmax.f32 %v308_v38, 0.0 }
 0x189   :  { %v310_v10 = vpop.f32.mrf.mxu1 }
 0x18a   :  { %v311_v36 = vadd.f32 %v647_v15, %v310_v10 }
 0x18c   :  { %v338_v42 = vmax.f32 %v311_v36, 0.0 }
 0x191   :  { %v313_v11 = vpop.f32.mrf.mxu1 }
 0x192   :  { %v314_v33 = vadd.f32 %v647_v15, %v313_v11 }
 0x194   :  { %v339_v39 = vmax.f32 %v314_v33, 0.0 }
 0x199   :  { %v316_v12 = vpop.f32.mrf.mxu1 }
 0x19a   :  { %v317_v31 = vadd.f32 %v647_v15, %v316_v12 }
 0x19c   :  { %v340_v37 = vmax.f32 %v317_v31, 0.0 }
 0x1a1   :  { %v319_v13 = vpop.f32.mrf.mxu1 }
 0x1a2   :  { %v320_v28 = vadd.f32 %v647_v15, %v319_v13 }
 0x1a4   :  { %v341_v34 = vmax.f32 %v320_v28, 0.0 }
 0x1a9   :  { %v322_v14 = vpop.f32.mrf.mxu1 }
 0x1aa   :  { %v323_v26 = vadd.f32 %v647_v15, %v322_v14 }
 0x1ac   :  { %v342_v32 = vmax.f32 %v323_v26, 0.0 }
 0x1b1   :  { %v325_v24 = vpop.f32.mrf.mxu1 }
 0x1b2   :  { %v326_v27 = vadd.f32 %v647_v15, %v325_v24 }
 0x1b4   :  { %v343_v29 = vmax.f32 %v326_v27, 0.0 }
 0x1b6   :  { %344 = vmatpush.msra.mxu2 %v343_v29 }
 0x1b8   :  { %345 = vmatpush.msra.mxu2 %v342_v32 }
 0x1ba   :  { %346 = vmatpush.msra.mxu2 %v341_v34 }
 0x1bc   :  { %347 = vmatpush.msra.mxu2 %v340_v37 }
 0x1be   :  { %348 = vmatpush.msra.mxu2 %v339_v39 }
 0x1c0   :  { %349 = vmatpush.msra.mxu2 %v338_v42 }
 0x1c2   :  { %350 = vmatpush.msra.mxu2 %v337_v48  ;;  %v648_v48 = vld [vmem:[%s1060_s6] ss:$0 sm:$0xff] }
 0x1c4   :  { %351 = vmatpush.msra.mxu2 %v336_v50 }
 0x1c6   :  { %352 = vmatpush.msra.mxu2 %v335_v52  ;;  %v529_v52 = vld [vmem:[#allocation11 + $0x70] sm:$0xff] }
 0x1c7   :  { %536 = vmatpush.msrb.mxu1 %v529_v52  ;;  %v650_v52 = vld [vmem:[%s1064_s10] ss:$0 sm:$0xff] }
 0x1c8   :  { %353 = vmatpush.msra.mxu2 %v334_v54  ;;  %v528_v54 = vld [vmem:[#allocation11 + $0x68] sm:$0xff] }
 0x1c9   :  { %537 = vmatpush.msrb.mxu1 %v528_v54 }
 0x1ca   :  { %354 = vmatpush.msra.mxu2 %v333_v56  ;;  %v527_v56 = vld [vmem:[#allocation11 + $0x60] sm:$0xff] }
 0x1cb   :  { %538 = vmatpush.msrb.mxu1 %v527_v56 }
 0x1cc   :  { %355 = vmatpush.msra.mxu2 %v332_v58  ;;  %v526_v58 = vld [vmem:[#allocation11 + $0x58] sm:$0xff] }
 0x1cd   :  { %539 = vmatpush.msrb.mxu1 %v526_v58 }
 0x1ce   :  { %356 = vmatpush.msra.mxu2 %v331_v60  ;;  %v525_v60 = vld [vmem:[#allocation11 + $0x50] sm:$0xff] }
 0x1cf   :  { %540 = vmatpush.msrb.mxu1 %v525_v60 }
 0x1d0   :  { %357 = vmatpush.msra.mxu2 %v330_v62  ;;  %v524_v62 = vld [vmem:[#allocation11 + $0x48] sm:$0xff] }
 0x1d1   :  { %541 = vmatpush.msrb.mxu1 %v524_v62 }
 0x1d2   :  { %358 = vmatpush.msra.mxu2 %v329_v63 }
 0x1d4   :  { %359 = vmatpush.msra.mxu2 %v328_v5  ;;  %v523_v5 = vld [vmem:[#allocation11 + $0x40] sm:$0xff] }
 0x1d5   :  { %360 = vmatmul.f32.vlgmr.msra.gmra.mxu2 %v966_v16  ;;  %v422_v16 = vld [vmem:[#allocation10 + $0x68] sm:$0xff]  ;;  %542 = vmatpush.msrb.mxu1 %v523_v5 }
 0x1d6   :  { %431 = vmatpush.msra.mxu3 %v422_v16 }
 0x1d7   :  { %543 = vmatpush.msrb.mxu1 %v522_v1 }
 0x1dd   :  { %363 = vmatmul.f32.gmra.mxu2 %v969_v17  ;;  %v421_v17 = vld [vmem:[#allocation10 + $0x60] sm:$0xff] }
 0x1de   :  { %432 = vmatpush.msra.mxu3 %v421_v17  ;;  %v521_v17 = vld [vmem:[#allocation11 + $0x30] sm:$0xff] }
 0x1df   :  { %544 = vmatpush.msrb.mxu1 %v521_v17 }
 0x1e5   :  { %366 = vmatmul.f32.gmra.mxu2 %v972_v18  ;;  %v420_v18 = vld [vmem:[#allocation10 + $0x58] sm:$0xff] }
 0x1e6   :  { %433 = vmatpush.msra.mxu3 %v420_v18 }
 0x1ed   :  { %369 = vmatmul.f32.gmra.mxu2 %v975_v19  ;;  %v419_v19 = vld [vmem:[#allocation10 + $0x50] sm:$0xff] }
 0x1ee   :  { %434 = vmatpush.msra.mxu3 %v419_v19  ;;  %v520_v19 = vld [vmem:[#allocation11 + $0x28] sm:$0xff] }
 0x1ef   :  { %545 = vmatpush.msrb.mxu1 %v520_v19 }
 0x1f5   :  { %372 = vmatmul.f32.gmra.mxu2 %v978_v20  ;;  %v418_v20 = vld [vmem:[#allocation10 + $0x48] sm:$0xff] }
 0x1f6   :  { %435 = vmatpush.msra.mxu3 %v418_v20 }
 0x1fd   :  { %375 = vmatmul.f32.gmra.mxu2 %v981_v21  ;;  %v417_v21 = vld [vmem:[#allocation10 + $0x40] sm:$0xff] }
 0x1fe   :  { %436 = vmatpush.msra.mxu3 %v417_v21  ;;  %v519_v21 = vld [vmem:[#allocation11 + $0x20] sm:$0xff] }
 0x1ff   :  { %546 = vmatpush.msrb.mxu1 %v519_v21 }
 0x205   :  { %378 = vmatmul.f32.gmra.mxu2 %v984_v22  ;;  %v416_v22 = vld [vmem:[#allocation10 + $0x38] sm:$0xff] }
 0x206   :  { %437 = vmatpush.msra.mxu3 %v416_v22 }
 0x20d   :  { %381 = vmatmul.f32.gmra.mxu2 %v987_v23  ;;  %v415_v23 = vld [vmem:[#allocation10 + $0x30] sm:$0xff] }
 0x20e   :  { %438 = vmatpush.msra.mxu3 %v415_v23  ;;  %v518_v23 = vld [vmem:[#allocation11 + $0x18] sm:$0xff] }
 0x20f   :  { %547 = vmatpush.msrb.mxu1 %v518_v23 }
 0x215   :  { %384 = vmatmul.f32.gmra.mxu2 %v990_v25  ;;  %v414_v25 = vld [vmem:[#allocation10 + $0x28] sm:$0xff] }
 0x216   :  { %439 = vmatpush.msra.mxu3 %v414_v25 }
 0x21d   :  { %387 = vmatmul.f32.gmra.mxu2 %v993_v30  ;;  %v413_v30 = vld [vmem:[#allocation10 + $0x20] sm:$0xff] }
 0x21e   :  { %440 = vmatpush.msra.mxu3 %v413_v30  ;;  %v517_v30 = vld [vmem:[#allocation11 + $0x10] sm:$0xff] }
 0x21f   :  { %548 = vmatpush.msrb.mxu1 %v517_v30 }
 0x220   :  { %441 = vmatpush.msra.mxu3 %v412_v2 }
 0x222   :  { %442 = vmatpush.msra.mxu3 %v411_v3  ;;  %v516_v3 = vld [vmem:[#allocation11 + $0x8] sm:$0xff] }
 0x223   :  { %549 = vmatpush.msrb.mxu1 %v516_v3 }
 0x224   :  { %443 = vmatpush.msra.mxu3 %v410_v4 }
 0x225   :  { %390 = vmatmul.f32.gmra.mxu2 %v996_v35  ;;  %v409_v35 = vld [vmem:[#allocation10] sm:$0xff] }
 0x226   :  { %444 = vmatpush.msra.mxu3 %v409_v35 }
 0x22d   :  { %393 = vmatmul.f32.gmra.mxu2 %v999_v40 }
 0x235   :  { %396 = vmatmul.f32.gmra.mxu2 %v1002_v44 }
 0x23d   :  { %399 = vmatmul.f32.gmra.mxu2 %v1005_v45 }
 0x245   :  { %402 = vmatmul.f32.gmra.mxu2 %v1008_v46 }
 0x24d   :  { %405 = vmatmul.f32.gmra.mxu2 %v1011_v47 }
 0x258   :  { %v361_v40 = vpop.f32.mrf.mxu2 }
 0x259   :  { %445 = vmatmul.f32.vlgmr.msra.gmra.mxu3 %v361_v40  ;;  %v494_v40 = vld [vmem:[#allocation7] sm:$0xff] }
 0x260   :  { %v364_v6 = vpop.f32.mrf.mxu2 }
 0x261   :  { %448 = vmatmul.f32.gmra.mxu3 %v364_v6  ;;  %v515_v6 = vld [vmem:[#allocation11] sm:$0xff] }
 0x262   :  { %550 = vmatpush.msrb.mxu1 %v515_v6 }
 0x268   :  { %v367_v7 = vpop.f32.mrf.mxu2 }
 0x269   :  { %451 = vmatmul.f32.gmra.mxu3 %v367_v7  ;;  %v589_v7 = vld [vmem:[#allocation13 + $0x78] sm:$0xff] }
 0x26a   :  { %594 = vmatpush.msrb.mxu2 %v589_v7 }
 0x270   :  { %v370_v8 = vpop.f32.mrf.mxu2 }
 0x271   :  { %454 = vmatmul.f32.gmra.mxu3 %v370_v8  ;;  %v588_v8 = vld [vmem:[#allocation13 + $0x70] sm:$0xff] }
 0x272   :  { %595 = vmatpush.msrb.mxu2 %v588_v8 }
 0x278   :  { %v373_v9 = vpop.f32.mrf.mxu2 }
 0x279   :  { %457 = vmatmul.f32.gmra.mxu3 %v373_v9  ;;  %v587_v9 = vld [vmem:[#allocation13 + $0x68] sm:$0xff] }
 0x27a   :  { %596 = vmatpush.msrb.mxu2 %v587_v9 }
 0x280   :  { %v376_v44 = vpop.f32.mrf.mxu2 }
 0x281   :  { %460 = vmatmul.f32.gmra.mxu3 %v376_v44  ;;  %v586_v44 = vld [vmem:[#allocation13 + $0x60] sm:$0xff] }
 0x282   :  { %597 = vmatpush.msrb.mxu2 %v586_v44 }
 0x288   :  { %v379_v10 = vpop.f32.mrf.mxu2 }
 0x289   :  { %463 = vmatmul.f32.gmra.mxu3 %v379_v10  ;;  %v585_v10 = vld [vmem:[#allocation13 + $0x58] sm:$0xff] }
 0x28a   :  { %598 = vmatpush.msrb.mxu2 %v585_v10 }
 0x290   :  { %v382_v11 = vpop.f32.mrf.mxu2 }
 0x291   :  { %466 = vmatmul.f32.gmra.mxu3 %v382_v11  ;;  %v584_v11 = vld [vmem:[#allocation13 + $0x50] sm:$0xff] }
 0x292   :  { %599 = vmatpush.msrb.mxu2 %v584_v11 }
 0x298   :  { %v385_v45 = vpop.f32.mrf.mxu2 }
 0x299   :  { %469 = vmatmul.f32.gmra.mxu3 %v385_v45  ;;  %v583_v45 = vld [vmem:[#allocation13 + $0x48] sm:$0xff] }
 0x29a   :  { %600 = vmatpush.msrb.mxu2 %v583_v45 }
 0x2a0   :  { %v388_v46 = vpop.f32.mrf.mxu2 }
 0x2a1   :  { %472 = vmatmul.f32.gmra.mxu3 %v388_v46  ;;  %v582_v46 = vld [vmem:[#allocation13 + $0x40] sm:$0xff] }
 0x2a2   :  { %601 = vmatpush.msrb.mxu2 %v582_v46 }
 0x2a8   :  { %v391_v47 = vpop.f32.mrf.mxu2 }
 0x2a9   :  { %475 = vmatmul.f32.gmra.mxu3 %v391_v47  ;;  %v581_v47 = vld [vmem:[#allocation13 + $0x38] sm:$0xff] }
 0x2aa   :  { %602 = vmatpush.msrb.mxu2 %v581_v47 }
 0x2b0   :  { %v394_v12 = vpop.f32.mrf.mxu2 }
 0x2b1   :  { %478 = vmatmul.f32.gmra.mxu3 %v394_v12  ;;  %v580_v12 = vld [vmem:[#allocation13 + $0x30] sm:$0xff] }
 0x2b2   :  { %603 = vmatpush.msrb.mxu2 %v580_v12 }
 0x2b8   :  { %v397_v13 = vpop.f32.mrf.mxu2 }
 0x2b9   :  { %481 = vmatmul.f32.gmra.mxu3 %v397_v13  ;;  %v579_v13 = vld [vmem:[#allocation13 + $0x28] sm:$0xff] }
 0x2ba   :  { %604 = vmatpush.msrb.mxu2 %v579_v13 }
 0x2c0   :  { %v400_v14 = vpop.f32.mrf.mxu2 }
 0x2c1   :  { %484 = vmatmul.f32.gmra.mxu3 %v400_v14 }
 0x2c8   :  { %v403_v15 = vpop.f32.mrf.mxu2 }
 0x2c9   :  { %487 = vmatmul.f32.gmra.mxu3 %v403_v15  ;;  %v578_v15 = vld [vmem:[#allocation13 + $0x20] sm:$0xff] }
 0x2ca   :  { %605 = vmatpush.msrb.mxu2 %v578_v15 }
 0x2d0   :  { %v406_v24 = vpop.f32.mrf.mxu2 }
 0x2d1   :  { %490 = vmatmul.f32.gmra.mxu3 %v406_v24  ;;  %v577_v24 = vld [vmem:[#allocation13 + $0x18] sm:$0xff] }
 0x2d2   :  { %606 = vmatpush.msrb.mxu2 %v577_v24 }
 0x2dc   :  { %v1033_v26 = vpop.f32.mrf.mxu3 }
 0x2dd   :  { %v447_v35 = vadd.f32 %v648_v48, %v1033_v26  ;;  %v576_v26 = vld [vmem:[#allocation13 + $0x10] sm:$0xff] }
 0x2de   :  { %607 = vmatpush.msrb.mxu2 %v576_v26 }
 0x2e4   :  { %v1035_v27 = vpop.f32.mrf.mxu3 }
 0x2e5   :  { %v450_v4 = vadd.f32 %v648_v48, %v1035_v27  ;;  %v575_v27 = vld [vmem:[#allocation13 + $0x8] sm:$0xff] }
 0x2e6   :  { %608 = vmatpush.msrb.mxu2 %v575_v27 }
 0x2ec   :  { %v1037_v28 = vpop.f32.mrf.mxu3 }
 0x2ed   :  { %v453_v2 = vadd.f32 %v648_v48, %v1037_v28  ;;  %v574_v28 = vld [vmem:[#allocation13] sm:$0xff] }
 0x2ee   :  { %609 = vmatpush.msrb.mxu2 %v574_v28 }
 0x2f4   :  { %v455_v29 = vpop.f32.mrf.mxu3 }
 0x2f5   :  { %v456_v25 = vadd.f32 %v648_v48, %v455_v29  ;;  %v649_v29 = vld [vmem:[%s1062_s8] ss:$0 sm:$0xff] }
 0x2fc   :  { %v458_v31 = vpop.f32.mrf.mxu3 }
 0x2fd   :  { %v459_v22 = vadd.f32 %v648_v48, %v458_v31 }
 0x304   :  { %v461_v32 = vpop.f32.mrf.mxu3 }
 0x305   :  { %v462_v20 = vadd.f32 %v648_v48, %v461_v32 }
 0x30c   :  { %v464_v33 = vpop.f32.mrf.mxu3 }
 0x30d   :  { %v465_v18 = vadd.f32 %v648_v48, %v464_v33 }
 0x314   :  { %v467_v34 = vpop.f32.mrf.mxu3 }
 0x315   :  { %v468_v16 = vadd.f32 %v648_v48, %v467_v34 }
 0x31c   :  { %v470_v36 = vpop.f32.mrf.mxu3 }
 0x31d   :  { %v471_v0 = vadd.f32 %v648_v48, %v470_v36 }
 0x324   :  { %v473_v37 = vpop.f32.mrf.mxu3 }
 0x325   :  { %v474_v63 = vadd.f32 %v648_v48, %v473_v37 }
 0x32c   :  { %v476_v38 = vpop.f32.mrf.mxu3 }
 0x32d   :  { %v477_v61 = vadd.f32 %v648_v48, %v476_v38 }
 0x334   :  { %v479_v39 = vpop.f32.mrf.mxu3 }
 0x335   :  { %v480_v59 = vadd.f32 %v648_v48, %v479_v39 }
 0x33c   :  { %v482_v41 = vpop.f32.mrf.mxu3 }
 0x33d   :  { %v483_v57 = vadd.f32 %v648_v48, %v482_v41 }
 0x344   :  { %v485_v42 = vpop.f32.mrf.mxu3 }
 0x345   :  { %v486_v55 = vadd.f32 %v648_v48, %v485_v42 }
 0x34c   :  { %v488_v43 = vpop.f32.mrf.mxu3 }
 0x34d   :  { %v489_v53 = vadd.f32 %v648_v48, %v488_v43 }
 0x354   :  { %v491_v49 = vpop.f32.mrf.mxu3 }
 0x355   :  { %v492_v50 = vadd.f32 %v648_v48, %v491_v49 }
 0x357   :  { %495 = vmatpush.msrb.mxu0 %v492_v50 }
 0x359   :  { %496 = vmatpush.msrb.mxu0 %v489_v53 }
 0x35b   :  { %497 = vmatpush.msrb.mxu0 %v486_v55 }
 0x35d   :  { %498 = vmatpush.msrb.mxu0 %v483_v57 }
 0x35f   :  { %499 = vmatpush.msrb.mxu0 %v480_v59 }
 0x361   :  { %500 = vmatpush.msrb.mxu0 %v477_v61 }
 0x363   :  { %501 = vmatpush.msrb.mxu0 %v474_v63 }
 0x365   :  { %502 = vmatpush.msrb.mxu0 %v471_v0 }
 0x367   :  { %503 = vmatpush.msrb.mxu0 %v468_v16 }
 0x369   :  { %504 = vmatpush.msrb.mxu0 %v465_v18 }
 0x36b   :  { %505 = vmatpush.msrb.mxu0 %v462_v20 }
 0x36d   :  { %506 = vmatpush.msrb.mxu0 %v459_v22 }
 0x36f   :  { %507 = vmatpush.msrb.mxu0 %v456_v25 }
 0x371   :  { %508 = vmatpush.msrb.mxu0 %v453_v2 }
 0x373   :  { %509 = vmatpush.msrb.mxu0 %v450_v4 }
 0x375   :  { %510 = vmatpush.msrb.mxu0 %v447_v35 }
 0x376   :  { %511 = vmatmul.f32.vlgmr.msrb.gmra.mxu0 %v494_v40 }
 0x3f3   :  { %v512_v14 = vpop.f32.mrf.mxu0 }
 0x3f4   :  { %551 = vmatmul.f32.vlgmr.msrb.gmra.mxu1 %v512_v14 }
 0x471   :  { %v552_v31 = vpop.f32.mrf.mxu1 }
 0x472   :  { %v553_v32 = vadd.f32 %v649_v29, %v552_v31 }
 0x474   :  { %v636_v33 = vmul.f32 -1.442695, %v553_v32 }
 0x476   :  { %651 = vpow2.f32 %v636_v33 }
 0x47c   :  { %v652_v34 = vpop.eup %651 }
 0x47d   :  { %v558_v36 = vadd.f32 1.0, %v652_v34 }
 0x47f   :  { %653 = vrcp.f32 %v558_v36  ;;  %v570_v41 = vand.u32 2147483648, %v558_v36  ;;  %v568_v43 = vand.u32 2147483647, %v558_v36  ;;  %vm564_vm1 = vweird.f32 %v558_v36 }
 0x481   :  { %v571_v49 = vor.u32 1.1754944e-38, %v570_v41  ;;  %vm569_vm3 = vcmp.eq.f32.partialorder %v568_v43, 8.507059e+37 }
 0x485   :  { %v654_v37 = vpop.eup %653 }
 0x486   :  { %v560_v38 = vmul.f32 %v654_v37, %v558_v36  ;;  %vm565_vm0 = vweird.f32 %v654_v37 }
 0x487   :  { %vm566_vm2 = vmor %vm564_vm1, %vm565_vm0 }
 0x488   :  { %v561_v39 = vsub.f32 1.0, %v560_v38 }
 0x48a   :  { %v562_v42 = vmul.f32 %v654_v37, %v561_v39 }
 0x48c   :  { %v563_v48 = vadd.f32 %v654_v37, %v562_v42 }
 0x48e   :  { %v567_v50 = vsel %vm566_vm2, %v654_v37, %v563_v48 }
 0x48f   :  { %v572_v51 = vsel %vm569_vm3, %v571_v49, %v567_v50 }
 0x490   :  { %610 = vmatmul.f32.vlgmr.msrb.gmra.mxu2 %v572_v51 }
 0x513   :  { %v611_v53 = vpop.f32.mrf.mxu2 }
 0x514   :  { %v612_v54 = vadd.f32 %v650_v52, %v611_v53 }
 0x516   :  { %v614_v55 = vpack.c.bf16 %v612_v54, %v612_v54 }
 0x518   :  { %615 = vst [vmem:[#allocation14] sm:$0xf] %v614_v55 }
 0x519   :  { %626 = dma.vmem_to_hbm [thread:$0]  %s622_s13, 64, %s624_s16, [#allocation4]  }
 0x51a   :  { %855 = dma.done.wait [#allocation4], 64  }
 0x51b   :  { %856 = vsyncadd [#allocation4], 4294967232 }
 0x51c   :  { %631 = vsyncpa [#allocation3], 1 }
 0x51d   :  { %632 = vsyncpa [#allocation6], 1 }
 0x51e   :  { %633 = vsyncpa [#allocation9], 1 }
 0x51f   :  { %634 = vsyncpa [#allocation12], 1 }
 0x520   :  { %635 = vsyncpa [#allocation4], 1 }

</bundles_post_ra>
